<compile_context>
chip_gen: v5e
topology: v5e:2x2
jax: 0.10.0
libtpu: 0.0.40
codegen_flags: <defaults>
</compile_context>

<pallas_src>
import jax
import jax.numpy as jnp
from jax.experimental import pallas as pl
from jax.experimental.pallas import tpu as pltpu

_MIB = 1024 * 1024


def _sublane_multiple(dtype) -> int:
    """Second-to-last-dim packing multiple for a dtype (8 / 16 / 32)."""
    itemsize = jnp.dtype(dtype).itemsize
    return {4: 8, 2: 16, 1: 32}.get(itemsize, 8)


def _vmem_limit_and_tile_budget():
    """Generation-aware scoped-VMEM request and tile-byte budget."""
    phys = 64 * _MIB  # conservative default: v7x per-TensorCore VMEM
    try:
        info = pltpu.get_tpu_info()
        phys = int(getattr(info, "vmem_capacity_bytes", phys))
    except Exception:
        pass
    limit = min(phys // 2, 64 * _MIB)   # scoped VMEM requested from Mosaic
    budget = limit // 2                 # double-buffered in+out tiles <= half
    return limit, budget


def _select_block(M, N, in_dtype, out_dtype, budget_bytes,
                  max_tm=1024, max_tn=4096):
    """Pick a (tm, tn) block; prefer a lane-dense full-width row block."""
    sub_m = _sublane_multiple(in_dtype)
    # Pipelined per-element cost: input + output tile, each double-buffered.
    per_elem = 2 * (jnp.dtype(in_dtype).itemsize + jnp.dtype(out_dtype).itemsize)

    full_row_bytes = per_elem * N
    if full_row_bytes * min(M, sub_m) <= budget_bytes:
        # 1-D row grid with a full-width (lane-dense) block (tm, N).
        rows = max(budget_bytes // full_row_bytes, 1)
        tm = min(M, max_tm, rows)
        if tm < M:
            tm = max(sub_m, (tm // sub_m) * sub_m)  # keep sublane packing
        return tm, N

    # Fallback (extremely wide rows): 2-D tiling with a wide 128-multiple tn.
    tm = M if M < sub_m else sub_m
    cols = max(budget_bytes // (per_elem * tm), 128)
    tn = min(N, max_tn, (cols // 128) * 128)
    return tm, tn


def _make_transform_kernel(transformation, compute_dtype):
    """Pallas kernel body applying `transformation` elementwise to one tile."""

    def kernel(x_ref, o_ref):
        x = x_ref[...]
        if compute_dtype is not None and x.dtype != jnp.dtype(compute_dtype):
            # e.g. bf16 -> f32: v5e has no native bf16 VPU/EUP path; the cast
            # is hidden behind the HBM stream on all generations.
            x = x.astype(compute_dtype)
        o_ref[...] = transformation(x).astype(o_ref.dtype)

    return kernel


class PallasWrapperModule:
    """JAX/Pallas analogue of scFNN's WrapperModule.

    Holds an arbitrary jnp-traceable transformation and applies it to the
    input via a tiled Pallas TPU kernel.  The fast path assumes the
    transformation is elementwise (true for scFNN's log1p / exp / scaling
    wrappers); set elementwise=False to keep the natural 2-D [cells, genes]
    blocking (transformation must then be independent across row blocks).
    """

    def __init__(self, transformation, description="",
                 elementwise=True, compute_dtype="auto", donate_input=False):
        self.transformation = transformation
        self.description = description
        self.elementwise = elementwise
        self.compute_dtype = compute_dtype
        self.donate_input = donate_input

    def __repr__(self):
        return self.description

    def _resolve_compute_dtype(self, in_dtype):
        if self.compute_dtype == "auto":
            if jnp.dtype(in_dtype) in (jnp.dtype(jnp.bfloat16),
                                       jnp.dtype(jnp.float16)):
                return jnp.float32
            return None
        return self.compute_dtype

    def __call__(self, x):
        x = jnp.asarray(x)
        orig_shape = x.shape

        # Output dtype/shape come from the transformation itself (an int count
        # matrix through log1p must yield floats, not truncated ints).
        out_sds = jax.eval_shape(
            self.transformation, jax.ShapeDtypeStruct(x.shape, x.dtype))
        if out_sds.shape != x.shape:
            raise ValueError(
                "Pallas WrapperModule path requires a shape-preserving "
                f"transformation, got {x.shape} -> {out_sds.shape}")
        out_dtype = out_sds.dtype

        # --- Layout plumbing: present a lane-dense 2-D slab to the kernel ---
        if self.elementwise:
            total = int(x.size)
            if x.ndim == 2 and x.shape[1] % 128 == 0 and x.shape[1] >= 512:
                work_shape = x.shape            # already lane-dense
            else:
                work_shape = None
                for w in range(8192, 127, -128):   # widest 128-multiple divisor
                    if total % w == 0:
                        work_shape = (total // w, w)
                        break
                if work_shape is None:             # no 128-multiple divisor
                    work_shape = x.shape if x.ndim == 2 else (1, total)
            x_work = x.reshape(work_shape)
        else:
            if x.ndim != 2:
                raise ValueError(
                    "non-elementwise path expects a 2-D [cells, genes] input")
            x_work = x

        M, N = x_work.shape
        vmem_limit, budget = _vmem_limit_and_tile_budget()
        tm, tn = _select_block(M, N, x_work.dtype, out_dtype, budget)

        kernel = _make_transform_kernel(
            self.transformation, self._resolve_compute_dtype(x_work.dtype))

        if tn == N:
            grid = (pl.cdiv(M, tm),)
            in_specs = [pl.BlockSpec((tm, N), lambda i: (i, 0))]
            out_specs = pl.BlockSpec((tm, N), lambda i: (i, 0))
            dim_sem = ("parallel",)
        else:
            grid = (pl.cdiv(M, tm), pl.cdiv(N, tn))
            in_specs = [pl.BlockSpec((tm, tn), lambda i, j: (i, j))]
            out_specs = pl.BlockSpec((tm, tn), lambda i, j: (i, j))
            dim_sem = ("parallel", "parallel")
        # TODO(synk): on v7x (2 TensorCores/chip) use pltpu.CORE_PARALLEL on the
        # row axis to shard this mem-bound stream across both cores.

        call_kwargs = {}
        if self.donate_input and jnp.dtype(out_dtype) == x_work.dtype:
            call_kwargs["input_output_aliases"] = {0: 0}

        out = pl.pallas_call(
            kernel,
            out_shape=jax.ShapeDtypeStruct((M, N), out_dtype),
            grid_spec=pltpu.PrefetchScalarGridSpec(
                num_scalar_prefetch=0,
                grid=grid,
                in_specs=in_specs,
                out_specs=out_specs,
            ),
            compiler_params=pltpu.CompilerParams(
                dimension_semantics=dim_sem,
                vmem_limit_bytes=vmem_limit,
            ),
            **call_kwargs,
        )(x_work)
        return out.reshape(orig_shape)


if __name__ == "__main__":
    key = jax.random.PRNGKey(0)
    k1, k2 = jax.random.split(key)

    module = PallasWrapperModule(jnp.log1p, description="log1p transform")

    # 1) Canonical scFNN use: log1p on a small float count-like matrix with a
    #    gene count that is NOT a multiple of 128 (realistic shapes).
    x_f32 = jax.random.uniform(k1, (96, 300), dtype=jnp.float32, maxval=10.0)
    out = jax.block_until_ready(module(x_f32))
    ref = jnp.log1p(x_f32)
    assert out.shape == x_f32.shape and out.dtype == ref.dtype
    assert jnp.allclose(out, ref, atol=1e-5, rtol=1e-5)

    # 2) Integer raw-count matrix: output dtype follows the transformation
    #    (float32), not the int32 input dtype.
    x_int = jax.random.randint(k2, (64, 384), 0, 50, dtype=jnp.int32)
    out_i = jax.block_until_ready(module(x_int))
    ref_i = jnp.log1p(x_int)
    assert out_i.dtype == ref_i.dtype
    assert jnp.allclose(out_i, ref_i, atol=1e-5, rtol=1e-5)

    # 3) bf16 input: computed in f32 inside the kernel, stored back as bf16.
    x_bf16 = x_f32.astype(jnp.bfloat16)
    out_b = jax.block_until_ready(module(x_bf16))
    ref_b = jnp.log1p(x_bf16.astype(jnp.float32)).astype(jnp.bfloat16)
    assert out_b.dtype == jnp.bfloat16
    assert jnp.allclose(out_b.astype(jnp.float32), ref_b.astype(jnp.float32),
                        atol=2e-2, rtol=2e-2)

    print("KERNEL_OK")
</pallas_src>

<mosaic_0001>
module attributes {stable_mosaic.version = 11 : i64} {
  func.func @kernel(%arg0: i32, %arg1: memref<5x5760xf32, #tpu.memory_space<vmem>>, %arg2: memref<5x5760xf32, #tpu.memory_space<vmem>>) attributes {dimension_semantics = [#tpu.dimension_semantics<parallel>], iteration_bounds = array<i64: 1>, scalar_prefetch = 0 : i64, scratch_operands = 0 : i64, tpu.core_type = #tpu.core_type<tc>, window_params = [{transform_indices = @transform_0, window_bounds = array<i64: 5, 5760>}, {transform_indices = @transform_1, window_bounds = array<i64: 5, 5760>}]} {
    %c0 = arith.constant 0 : index
    %c0_0 = arith.constant 0 : index
    %0 = vector.load %arg1[%c0, %c0_0] : memref<5x5760xf32, #tpu.memory_space<vmem>>, vector<5x5760xf32>
    %1 = math.log1p %0 : vector<5x5760xf32>
    %c0_1 = arith.constant 0 : index
    %c0_2 = arith.constant 0 : index
    %2 = vector.load %arg2[%c0_1, %c0_2] : memref<5x5760xf32, #tpu.memory_space<vmem>>, vector<5x5760xf32>
    tpu.vector_store %arg2[%c0_1, %c0_2], %1 {strides = array<i32>} : memref<5x5760xf32, #tpu.memory_space<vmem>>, vector<5x5760xf32>,
    return
  }
  func.func @transform_0(%arg0: i32) -> (i32, i32) {
    %c0_i32 = arith.constant 0 : i32
    %c0_i32_0 = arith.constant 0 : i32
    return %arg0, %c0_i32 : i32, i32
  }
  func.func @transform_1(%arg0: i32) -> (i32, i32) {
    %c0_i32 = arith.constant 0 : i32
    %c0_i32_0 = arith.constant 0 : i32
    return %arg0, %c0_i32 : i32, i32
  }
}

</mosaic_0001>

<bundles_post_ra>
// kernel: tpu_custom_call.1
= control target key start
LH: loop header
LB: loop body
LE: loop exit
PB: predicated region body
PF: predicated region fallthrough
CT: control target
= control target key end

     0   :  { %6 = vsyncpa [#allocation3], 0  ;;  %s943_s0 = inlined_call_operand.hbm [shape: f32[5,5760], index: 0, kind: input, shape index: {}]   ;;  %s944_s1 = inlined_call_operand.hbm [shape: f32[5,5760], index: 1, kind: output, shape index: {}]  }
   0x1   :  { %7 = vsyncpa [#allocation4], 0  ;;  %s13_s8 = sshll.u32 %s943_s0, 4  ;;  %s679_s9 = smov [#allocation2]   ;;  %s14_s8 = int_to_ptr.hbm [resolvable:$true] %s13_s8 }
   0x2   :  { %s15_s10 = sshll.u32 %s679_s9, 4  ;;  %s16_s10 = int_to_ptr.vmem [resolvable:$true] %s15_s10 }
   0x3   :  { %18 = dma.hbm_to_vmem [thread:$0]  %s14_s8, 5760, %s16_s10, [#allocation3]  }
   0x4   :  { %675 = dma.done.wait [#allocation3], 5760  }
   0x5   :  { %676 = vsyncadd [#allocation3], 4294961536  ;;  %v23_v0 = vld [vmem:[#allocation2] sm:$0x1f]  ;;  %v24_v1 = vld [vmem:[#allocation2 + $0x8] sm:$0x1f] }
   0x6   :  { %v25_v2 = vld [vmem:[#allocation2 + $0x10] sm:$0x1f]  ;;  %v68_v3 = vadd.f32 1.0, %v23_v0  ;;  %v71_v4 = vmul.f32 -0.5, %v23_v0  ;;  %v74_v5 = vand.u32 2147483647, %v23_v0 }
   0x7   :  { %v77_v6 = vadd.f32 1.0, %v24_v1  ;;  %v80_v7 = vmul.f32 -0.5, %v24_v1  ;;  %v83_v8 = vand.u32 2147483647, %v24_v1  ;;  %v86_v9 = vadd.f32 1.0, %v25_v2  ;;  %s680_s0 = smov [#allocation5]  }
   0x8   :  { %v89_v10 = vmul.f32 -0.5, %v25_v2  ;;  %537 = vlog2.f32 %v68_v3  ;;  %v72_v11 = vadd.f32 1.0, %v71_v4  ;;  %vm694_vm0 = vcmp.lt.f32.partialorder %v74_v5, 0.0004427343  ;;  %v26_v17 = vld [vmem:[#allocation2 + $0x18] sm:$0x1f] }
   0x9   :  { %v92_v13 = vand.u32 2147483647, %v25_v2  ;;  %539 = vlog2.f32 %v77_v6  ;;  %v81_v14 = vadd.f32 1.0, %v80_v7  ;;  %vm698_vm1 = vcmp.lt.f32.partialorder %v83_v8, 0.0004427343  ;;  %s523_s11 = sshll.u32 %s680_s0, 4  ;;  %s524_s11 = int_to_ptr.vmem [resolvable:$true] %s523_s11 }
   0xa   :  { %v90_v16 = vadd.f32 1.0, %v89_v10  ;;  %541 = vlog2.f32 %v86_v9  ;;  %v95_v19 = vadd.f32 1.0, %v26_v17  ;;  %v27_v20 = vld [vmem:[#allocation2 + $0x20] sm:$0x1f]  ;;  %v73_v21 = vmul.f32 %v72_v11, %v23_v0  ;;  %v28_v25 = vld [vmem:[#allocation2 + $0x28] sm:$0x1f] }
   0xb   :  { %vm702_vm2 = vcmp.lt.f32.partialorder %v92_v13, 0.0004427343  ;;  %v82_v22 = vmul.f32 %v81_v14, %v24_v1  ;;  %v98_v23 = vmul.f32 -0.5, %v26_v17  ;;  %v101_v24 = vand.u32 2147483647, %v26_v17  ;;  %s525_s14 = sshll.u32 %s944_s1, 4  ;;  %s526_s14 = int_to_ptr.hbm [resolvable:$true] %s525_s14 }
   0xc   :  { %543 = vlog2.f32 %v95_v19  ;;  %v104_v26 = vadd.f32 1.0, %v27_v20  ;;  %v107_v27 = vmul.f32 -0.5, %v27_v20  ;;  %v110_v28 = vand.u32 2147483647, %v27_v20  ;;  %v29_v33 = vld [vmem:[#allocation2 + $0x30] sm:$0x1f] }
   0xd   :  { %v91_v29 = vmul.f32 %v90_v16, %v25_v2  ;;  %v99_v30 = vadd.f32 1.0, %v98_v23  ;;  %v113_v31 = vadd.f32 1.0, %v28_v25  ;;  %v116_v32 = vmul.f32 -0.5, %v28_v25  ;;  %v30_v42 = vld [vmem:[#allocation2 + $0x38] sm:$0x1f] }
   0xe   :  { %v538_v34 = vpop.eup %537  ;;  %vm706_vm3 = vcmp.lt.f32.partialorder %v101_v24, 0.0004427343  ;;  %545 = vlog2.f32 %v104_v26  ;;  %v108_v36 = vadd.f32 1.0, %v107_v27  ;;  %v119_v37 = vand.u32 2147483647, %v28_v25 }
   0xf   :  { %v540_v38 = vpop.eup %539  ;;  %v70_v39 = vmul.f32 0.6931472, %v538_v34  ;;  %v100_v40 = vmul.f32 %v99_v30, %v26_v17  ;;  %vm710_vm4 = vcmp.lt.f32.partialorder %v110_v28, 0.0004427343  ;;  %547 = vlog2.f32 %v113_v31  ;;  %v31_v56 = vld [vmem:[#allocation2 + $0x40] sm:$0x1f] }
  0x10   :  { %v542_v43 = vpop.eup %541  ;;  %v79_v44 = vmul.f32 0.6931472, %v540_v38  ;;  %v109_v45 = vmul.f32 %v108_v36, %v27_v20  ;;  %v117_v46 = vadd.f32 1.0, %v116_v32  ;;  %v122_v47 = vadd.f32 1.0, %v29_v33  ;;  %v32_v5 = vld [vmem:[#allocation2 + $0x48] sm:$0x1f] }
  0x11   :  { %v76_v48 = vsel %vm694_vm0, %v73_v21, %v70_v39  ;;  %v88_v49 = vmul.f32 0.6931472, %v542_v43  ;;  %vm716_vm5 = vcmp.lt.f32.partialorder %v119_v37, 0.0004427343  ;;  %v125_v51 = vmul.f32 -0.5, %v29_v33 }
  0x12   :  { %v544_v52 = vpop.eup %543  ;;  %473 = vst [vmem:[#allocation5] sm:$0x1f] %v76_v48  ;;  %v85_v53 = vsel %vm698_vm1, %v82_v22, %v79_v44  ;;  %549 = vlog2.f32 %v122_v47  ;;  %v128_v54 = vand.u32 2147483647, %v29_v33  ;;  %v131_v55 = vadd.f32 1.0, %v30_v42 }
  0x13   :  { %474 = vst [vmem:[#allocation5 + $0x8] sm:$0x1f] %v85_v53  ;;  %v94_v57 = vsel %vm702_vm2, %v91_v29, %v88_v49  ;;  %v97_v58 = vmul.f32 0.6931472, %v544_v52  ;;  %v126_v59 = vadd.f32 1.0, %v125_v51  ;;  %v134_v60 = vmul.f32 -0.5, %v30_v42 }
  0x14   :  { %v546_v61 = vpop.eup %545  ;;  %475 = vst [vmem:[#allocation5 + $0x10] sm:$0x1f] %v94_v57  ;;  %v118_v62 = vmul.f32 %v117_v46, %v28_v25  ;;  %vm724_vm6 = vcmp.lt.f32.partialorder %v128_v54, 0.0004427343  ;;  %551 = vlog2.f32 %v131_v55  ;;  %v137_v0 = vand.u32 2147483647, %v30_v42 }
  0x15   :  { %v548_v1 = vpop.eup %547  ;;  %v103_v2 = vsel %vm706_vm3, %v100_v40, %v97_v58  ;;  %v106_v3 = vmul.f32 0.6931472, %v546_v61  ;;  %v135_v4 = vadd.f32 1.0, %v134_v60  ;;  %v127_v7 = vmul.f32 %v126_v59, %v29_v33  ;;  %v33_v13 = vld [vmem:[#allocation2 + $0x50] sm:$0x1f] }
  0x16   :  { %476 = vst [vmem:[#allocation5 + $0x18] sm:$0x1f] %v103_v2  ;;  %v115_v6 = vmul.f32 0.6931472, %v548_v1  ;;  %vm730_vm7 = vcmp.lt.f32.partialorder %v137_v0, 0.0004427343 }
  0x17   :  { %v112_v9 = vsel %vm710_vm4, %v109_v45, %v106_v3  ;;  %v136_v10 = vmul.f32 %v135_v4, %v30_v42  ;;  %v140_v11 = vadd.f32 1.0, %v31_v56  ;;  %v143_v12 = vmul.f32 -0.5, %v31_v56  ;;  %v34_v14 = vld [vmem:[#allocation2 + $0x58] sm:$0x1f]  ;;  %v35_v30 = vld [vmem:[#allocation2 + $0x60] sm:$0x1f] }
  0x18   :  { %v550_v15 = vpop.eup %549  ;;  %477 = vst [vmem:[#allocation5 + $0x20] sm:$0x1f] %v112_v9  ;;  %v121_v16 = vsel %vm716_vm5, %v118_v62, %v115_v6  ;;  %v146_v17 = vand.u32 2147483647, %v31_v56  ;;  %v149_v18 = vadd.f32 1.0, %v32_v5  ;;  %v152_v19 = vmul.f32 -0.5, %v32_v5 }
  0x19   :  { %478 = vst [vmem:[#allocation5 + $0x28] sm:$0x1f] %v121_v16  ;;  %v124_v20 = vmul.f32 0.6931472, %v550_v15  ;;  %553 = vlog2.f32 %v140_v11  ;;  %v144_v21 = vadd.f32 1.0, %v143_v12  ;;  %v158_v22 = vadd.f32 1.0, %v33_v13 }
  0x1a   :  { %v552_v23 = vpop.eup %551  ;;  %vm738_vm8 = vcmp.lt.f32.partialorder %v146_v17, 0.0004427343  ;;  %555 = vlog2.f32 %v149_v18  ;;  %v153_v25 = vadd.f32 1.0, %v152_v19  ;;  %v155_v26 = vand.u32 2147483647, %v32_v5 }
  0x1b   :  { %v130_v27 = vsel %vm724_vm6, %v127_v7, %v124_v20  ;;  %v133_v28 = vmul.f32 0.6931472, %v552_v23  ;;  %v145_v29 = vmul.f32 %v144_v21, %v31_v56  ;;  %557 = vlog2.f32 %v158_v22  ;;  %v36_v31 = vld [vmem:[#allocation2 + $0x68] sm:$0x1f]  ;;  %v37_v55 = vld [vmem:[#allocation2 + $0x70] sm:$0x1f] }
  0x1c   :  { %479 = vst [vmem:[#allocation5 + $0x30] sm:$0x1f] %v130_v27  ;;  %v154_v32 = vmul.f32 %v153_v25, %v32_v5  ;;  %vm744_vm9 = vcmp.lt.f32.partialorder %v155_v26, 0.0004427343  ;;  %v161_v34 = vmul.f32 -0.5, %v33_v13  ;;  %v167_v35 = vadd.f32 1.0, %v34_v14 }
  0x1d   :  { %v139_v36 = vsel %vm730_vm7, %v136_v10, %v133_v28  ;;  %v164_v37 = vand.u32 2147483647, %v33_v13  ;;  %v170_v38 = vmul.f32 -0.5, %v34_v14  ;;  %v173_v39 = vand.u32 2147483647, %v34_v14 }
  0x1e   :  { %480 = vst [vmem:[#allocation5 + $0x38] sm:$0x1f] %v139_v36  ;;  %v162_v40 = vadd.f32 1.0, %v161_v34  ;;  %559 = vlog2.f32 %v167_v35  ;;  %v176_v41 = vadd.f32 1.0, %v35_v30  ;;  %v179_v42 = vmul.f32 -0.5, %v35_v30 }
  0x1f   :  { %v554_v43 = vpop.eup %553  ;;  %vm750_vm10 = vcmp.lt.f32.partialorder %v164_v37, 0.0004427343  ;;  %v171_v45 = vadd.f32 1.0, %v170_v38  ;;  %vm754_vm11 = vcmp.lt.f32.partialorder %v173_v39, 0.0004427343  ;;  %v185_v47 = vadd.f32 1.0, %v36_v31 }
  0x20   :  { %v556_v48 = vpop.eup %555  ;;  %v142_v49 = vmul.f32 0.6931472, %v554_v43  ;;  %v163_v50 = vmul.f32 %v162_v40, %v33_v13  ;;  %561 = vlog2.f32 %v176_v41  ;;  %v180_v51 = vadd.f32 1.0, %v179_v42  ;;  %v38_v59 = vld [vmem:[#allocation2 + $0x78] sm:$0x1f] }
  0x21   :  { %v558_v52 = vpop.eup %557  ;;  %v151_v53 = vmul.f32 0.6931472, %v556_v48  ;;  %v182_v54 = vand.u32 2147483647, %v35_v30  ;;  %563 = vlog2.f32 %v185_v47  ;;  %v188_v58 = vmul.f32 -0.5, %v36_v31 }
  0x22   :  { %v148_v56 = vsel %vm738_vm8, %v145_v29, %v142_v49  ;;  %v160_v57 = vmul.f32 0.6931472, %v558_v52  ;;  %v172_v61 = vmul.f32 %v171_v45, %v34_v14  ;;  %v191_v63 = vand.u32 2147483647, %v36_v31  ;;  %v39_v12 = vld [vmem:[#allocation2 + $0x80] sm:$0x1f] }
  0x23   :  { %481 = vst [vmem:[#allocation5 + $0x40] sm:$0x1f] %v148_v56  ;;  %v157_v60 = vsel %vm744_vm9, %v154_v32, %v151_v53  ;;  %vm762_vm12 = vcmp.lt.f32.partialorder %v182_v54, 0.0004427343  ;;  %v189_v2 = vadd.f32 1.0, %v188_v58  ;;  %v194_v3 = vadd.f32 1.0, %v37_v55 }
  0x24   :  { %v560_v0 = vpop.eup %559  ;;  %482 = vst [vmem:[#allocation5 + $0x48] sm:$0x1f] %v157_v60  ;;  %v166_v1 = vsel %vm750_vm10, %v163_v50, %v160_v57  ;;  %v197_v4 = vmul.f32 -0.5, %v37_v55  ;;  %v181_v6 = vmul.f32 %v180_v51, %v35_v30  ;;  %vm768_vm13 = vcmp.lt.f32.partialorder %v191_v63, 0.0004427343 }
  0x25   :  { %483 = vst [vmem:[#allocation5 + $0x50] sm:$0x1f] %v166_v1  ;;  %v169_v5 = vmul.f32 0.6931472, %v560_v0  ;;  %v190_v9 = vmul.f32 %v189_v2, %v36_v31  ;;  %565 = vlog2.f32 %v194_v3  ;;  %v200_v11 = vand.u32 2147483647, %v37_v55 }
  0x26   :  { %v562_v8 = vpop.eup %561  ;;  %v198_v10 = vadd.f32 1.0, %v197_v4  ;;  %v203_v16 = vadd.f32 1.0, %v38_v59  ;;  %v206_v17 = vmul.f32 -0.5, %v38_v59  ;;  %v40_v18 = vld [vmem:[#allocation2 + $0x88] sm:$0x1f]  ;;  %v212_v26 = vadd.f32 1.0, %v39_v12 }
  0x27   :  { %v564_v13 = vpop.eup %563  ;;  %v175_v14 = vsel %vm754_vm11, %v172_v61, %v169_v5  ;;  %v178_v15 = vmul.f32 0.6931472, %v562_v8  ;;  %vm774_vm14 = vcmp.lt.f32.partialorder %v200_v11, 0.0004427343  ;;  %v209_v23 = vand.u32 2147483647, %v38_v59 }
  0x28   :  { %484 = vst [vmem:[#allocation5 + $0x58] sm:$0x1f] %v175_v14  ;;  %v187_v19 = vmul.f32 0.6931472, %v564_v13  ;;  %567 = vlog2.f32 %v203_v16  ;;  %v207_v22 = vadd.f32 1.0, %v206_v17  ;;  %v215_v27 = vmul.f32 -0.5, %v39_v12 }
  0x29   :  { %v184_v21 = vsel %vm762_vm12, %v181_v6, %v178_v15  ;;  %v41_v24 = vld [vmem:[#allocation2 + $0x90] sm:$0x1f]  ;;  %v218_v28 = vand.u32 2147483647, %v39_v12  ;;  %v42_v29 = vld [vmem:[#allocation2 + $0x98] sm:$0x1f]  ;;  %v199_v30 = vmul.f32 %v198_v10, %v37_v55  ;;  %569 = vlog2.f32 %v212_v26 }
  0x2a   :  { %485 = vst [vmem:[#allocation5 + $0x60] sm:$0x1f] %v184_v21  ;;  %v193_v25 = vsel %vm768_vm13, %v190_v9, %v187_v19  ;;  %vm782_vm15 = vcmp.lt.f32.partialorder %v209_v23, 0.0004427343  ;;  %v221_v32 = vadd.f32 1.0, %v40_v18  ;;  %v224_v33 = vmul.f32 -0.5, %v40_v18 }
  0x2b   :  { %486 = vst [vmem:[#allocation5 + $0x68] sm:$0x1f] %v193_v25  ;;  %v566_v34 = vpop.eup %565  ;;  %v216_v35 = vadd.f32 1.0, %v215_v27  ;;  %vm786_vm0 = vcmp.lt.f32.partialorder %v218_v28, 0.0004427343  ;;  %v230_v40 = vadd.f32 1.0, %v41_v24  ;;  %v208_v41 = vmul.f32 %v207_v22, %v38_v59 }
  0x2c   :  { %v227_v37 = vand.u32 2147483647, %v40_v18  ;;  %v196_v38 = vmul.f32 0.6931472, %v566_v34  ;;  %571 = vlog2.f32 %v221_v32  ;;  %v225_v39 = vadd.f32 1.0, %v224_v33 }
  0x2d   :  { %v233_v42 = vmul.f32 -0.5, %v41_v24  ;;  %v236_v43 = vand.u32 2147483647, %v41_v24  ;;  %v43_v44 = vld [vmem:[#allocation2 + $0xa0] sm:$0x1f]  ;;  %573 = vlog2.f32 %v230_v40  ;;  %v239_v48 = vadd.f32 1.0, %v42_v29 }
  0x2e   :  { %v568_v45 = vpop.eup %567  ;;  %v202_v46 = vsel %vm774_vm14, %v199_v30, %v196_v38  ;;  %vm792_vm1 = vcmp.lt.f32.partialorder %v227_v37, 0.0004427343  ;;  %v217_v50 = vmul.f32 %v216_v35, %v39_v12  ;;  %v242_v52 = vmul.f32 -0.5, %v42_v29  ;;  %v44_v56 = vld [vmem:[#allocation2 + $0xa8] sm:$0x1f] }
  0x2f   :  { %487 = vst [vmem:[#allocation5 + $0x70] sm:$0x1f] %v202_v46  ;;  %v205_v49 = vmul.f32 0.6931472, %v568_v45  ;;  %v234_v51 = vadd.f32 1.0, %v233_v42  ;;  %v226_v53 = vmul.f32 %v225_v39, %v40_v18  ;;  %575 = vlog2.f32 %v239_v48  ;;  %v570_v57 = vpop.eup %569 }
  0x30   :  { %v245_v54 = vand.u32 2147483647, %v42_v29  ;;  %v248_v55 = vadd.f32 1.0, %v43_v44  ;;  %vm798_vm2 = vcmp.lt.f32.partialorder %v236_v43, 0.0004427343  ;;  %v243_v60 = vadd.f32 1.0, %v242_v52 }
  0x31   :  { %v211_v58 = vsel %vm782_vm15, %v208_v41, %v205_v49  ;;  %v251_v61 = vmul.f32 -0.5, %v43_v44  ;;  %v45_v62 = vld [vmem:[#allocation2 + $0xb0] sm:$0x1f]  ;;  %v214_v0 = vmul.f32 0.6931472, %v570_v57  ;;  %v235_v3 = vmul.f32 %v234_v51, %v41_v24 }
  0x32   :  { %v572_v63 = vpop.eup %571  ;;  %488 = vst [vmem:[#allocation5 + $0x78] sm:$0x1f] %v211_v58  ;;  %vm802_vm3 = vcmp.lt.f32.partialorder %v245_v54, 0.0004427343  ;;  %577 = vlog2.f32 %v248_v55  ;;  %v254_v5 = vand.u32 2147483647, %v43_v44  ;;  %v244_v14 = vmul.f32 %v243_v60, %v42_v29 }
  0x33   :  { %v223_v2 = vmul.f32 0.6931472, %v572_v63  ;;  %v252_v4 = vadd.f32 1.0, %v251_v61  ;;  %v574_v6 = vpop.eup %573  ;;  %v220_v7 = vsel %vm786_vm0, %v217_v50, %v214_v0  ;;  %v257_v8 = vadd.f32 1.0, %v44_v56  ;;  %v46_v11 = vld [vmem:[#allocation2 + $0xb8] sm:$0x1f] }
  0x34   :  { %v260_v9 = vmul.f32 -0.5, %v44_v56  ;;  %v263_v10 = vand.u32 2147483647, %v44_v56  ;;  %489 = vst [vmem:[#allocation5 + $0x80] sm:$0x1f] %v220_v7  ;;  %v266_v20 = vadd.f32 1.0, %v45_v62 }
  0x35   :  { %v229_v12 = vsel %vm792_vm1, %v226_v53, %v223_v2  ;;  %v232_v13 = vmul.f32 0.6931472, %v574_v6  ;;  %v253_v15 = vmul.f32 %v252_v4, %v43_v44  ;;  %v47_v16 = vld [vmem:[#allocation2 + $0xc0] sm:$0x1f]  ;;  %v576_v17 = vpop.eup %575  ;;  %vm810_vm4 = vcmp.lt.f32.partialorder %v254_v5, 0.0004427343 }
  0x36   :  { %490 = vst [vmem:[#allocation5 + $0x88] sm:$0x1f] %v229_v12  ;;  %579 = vlog2.f32 %v257_v8  ;;  %v261_v19 = vadd.f32 1.0, %v260_v9  ;;  %v241_v22 = vmul.f32 0.6931472, %v576_v17  ;;  %v269_v23 = vmul.f32 -0.5, %v45_v62 }
  0x37   :  { %v238_v21 = vsel %vm798_vm2, %v235_v3, %v232_v13  ;;  %v272_v24 = vand.u32 2147483647, %v45_v62  ;;  %v48_v25 = vld [vmem:[#allocation2 + $0xc8] sm:$0x1f]  ;;  %vm816_vm5 = vcmp.lt.f32.partialorder %v263_v10, 0.0004427343  ;;  %581 = vlog2.f32 %v266_v20 }
  0x38   :  { %v578_v26 = vpop.eup %577  ;;  %491 = vst [vmem:[#allocation5 + $0x90] sm:$0x1f] %v238_v21  ;;  %v275_v28 = vadd.f32 1.0, %v46_v11  ;;  %v278_v29 = vmul.f32 -0.5, %v46_v11  ;;  %v247_v30 = vsel %vm802_vm3, %v244_v14, %v241_v22  ;;  %v262_v32 = vmul.f32 %v261_v19, %v44_v56  ;;  %v49_v34 = vld [vmem:[#allocation2 + $0xd0] sm:$0x1f] }
  0x39   :  { %v250_v31 = vmul.f32 0.6931472, %v578_v26  ;;  %v270_v33 = vadd.f32 1.0, %v269_v23  ;;  %492 = vst [vmem:[#allocation5 + $0x98] sm:$0x1f] %v247_v30  ;;  %v284_v37 = vadd.f32 1.0, %v47_v16 }
  0x3a   :  { %583 = vlog2.f32 %v275_v28  ;;  %v279_v35 = vadd.f32 1.0, %v278_v29  ;;  %v281_v36 = vand.u32 2147483647, %v46_v11  ;;  %vm824_vm6 = vcmp.lt.f32.partialorder %v272_v24, 0.0004427343 }
  0x3b   :  { %v256_v38 = vsel %vm810_vm4, %v253_v15, %v250_v31  ;;  %v287_v40 = vmul.f32 -0.5, %v47_v16  ;;  %v290_v41 = vand.u32 2147483647, %v47_v16  ;;  %v271_v43 = vmul.f32 %v270_v33, %v45_v62  ;;  %v50_v46 = vld [vmem:[#allocation2 + $0xd8] sm:$0x1f] }
  0x3c   :  { %v580_v42 = vpop.eup %579  ;;  %493 = vst [vmem:[#allocation5 + $0xa0] sm:$0x1f] %v256_v38  ;;  %v280_v44 = vmul.f32 %v279_v35, %v46_v11  ;;  %585 = vlog2.f32 %v284_v37  ;;  %v293_v45 = vadd.f32 1.0, %v48_v25  ;;  %vm828_vm7 = vcmp.lt.f32.partialorder %v281_v36, 0.0004427343 }
  0x3d   :  { %v259_v47 = vmul.f32 0.6931472, %v580_v42  ;;  %v288_v49 = vadd.f32 1.0, %v287_v40  ;;  %v296_v50 = vmul.f32 -0.5, %v48_v25  ;;  %v582_v51 = vpop.eup %581  ;;  %v299_v52 = vand.u32 2147483647, %v48_v25 }
  0x3e   :  { %587 = vlog2.f32 %v293_v45  ;;  %v302_v53 = vadd.f32 1.0, %v49_v34  ;;  %v305_v54 = vmul.f32 -0.5, %v49_v34  ;;  %v268_v56 = vmul.f32 0.6931472, %v582_v51  ;;  %v51_v63 = vld [vmem:[#allocation2 + $0xe0] sm:$0x1f] }
  0x3f   :  { %v265_v55 = vsel %vm816_vm5, %v262_v32, %v259_v47  ;;  %vm834_vm8 = vcmp.lt.f32.partialorder %v290_v41, 0.0004427343  ;;  %v297_v58 = vadd.f32 1.0, %v296_v50  ;;  %v289_v60 = vmul.f32 %v288_v49, %v47_v16  ;;  %v52_v4 = vld [vmem:[#allocation2 + $0xe8] sm:$0x1f] }
  0x40   :  { %v584_v59 = vpop.eup %583  ;;  %494 = vst [vmem:[#allocation5 + $0xa8] sm:$0x1f] %v265_v55  ;;  %589 = vlog2.f32 %v302_v53  ;;  %v306_v61 = vadd.f32 1.0, %v305_v54  ;;  %v311_v62 = vadd.f32 1.0, %v50_v46  ;;  %v274_v0 = vsel %vm824_vm6, %v271_v43, %v268_v56  ;;  %v53_v13 = vld [vmem:[#allocation2 + $0xf0] sm:$0x1f] }
  0x41   :  { %v277_v1 = vmul.f32 0.6931472, %v584_v59  ;;  %vm840_vm9 = vcmp.lt.f32.partialorder %v299_v52, 0.0004427343  ;;  %v308_v3 = vand.u32 2147483647, %v49_v34  ;;  %v298_v6 = vmul.f32 %v297_v58, %v48_v25 }
  0x42   :  { %v586_v5 = vpop.eup %585  ;;  %495 = vst [vmem:[#allocation5 + $0xb0] sm:$0x1f] %v274_v0  ;;  %591 = vlog2.f32 %v311_v62  ;;  %v314_v7 = vmul.f32 -0.5, %v50_v46  ;;  %v317_v8 = vand.u32 2147483647, %v50_v46  ;;  %v320_v12 = vadd.f32 1.0, %v51_v63 }
  0x43   :  { %v283_v9 = vsel %vm828_vm7, %v280_v44, %v277_v1  ;;  %v286_v10 = vmul.f32 0.6931472, %v586_v5  ;;  %vm846_vm10 = vcmp.lt.f32.partialorder %v308_v3, 0.0004427343  ;;  %v307_v15 = vmul.f32 %v306_v61, %v49_v34  ;;  %v54_v22 = vld [vmem:[#allocation2 + $0xf8] sm:$0x1f] }
  0x44   :  { %v588_v14 = vpop.eup %587  ;;  %496 = vst [vmem:[#allocation5 + $0xb8] sm:$0x1f] %v283_v9  ;;  %v315_v16 = vadd.f32 1.0, %v314_v7  ;;  %vm850_vm11 = vcmp.lt.f32.partialorder %v317_v8, 0.0004427343  ;;  %v323_v18 = vmul.f32 -0.5, %v51_v63  ;;  %593 = vlog2.f32 %v320_v12 }
  0x45   :  { %v292_v19 = vsel %vm834_vm8, %v289_v60, %v286_v10  ;;  %v295_v20 = vmul.f32 0.6931472, %v588_v14  ;;  %v326_v21 = vand.u32 2147483647, %v51_v63  ;;  %v329_v26 = vadd.f32 1.0, %v52_v4 }
  0x46   :  { %v590_v23 = vpop.eup %589  ;;  %497 = vst [vmem:[#allocation5 + $0xc0] sm:$0x1f] %v292_v19  ;;  %v316_v24 = vmul.f32 %v315_v16, %v50_v46  ;;  %v324_v25 = vadd.f32 1.0, %v323_v18  ;;  %v332_v27 = vmul.f32 -0.5, %v52_v4  ;;  %v335_v31 = vand.u32 2147483647, %v52_v4 }
  0x47   :  { %v301_v28 = vsel %vm840_vm9, %v298_v6, %v295_v20  ;;  %v304_v29 = vmul.f32 0.6931472, %v590_v23  ;;  %vm858_vm12 = vcmp.lt.f32.partialorder %v326_v21, 0.0004427343  ;;  %595 = vlog2.f32 %v329_v26  ;;  %v55_v35 = vld [vmem:[#allocation2 + $0x100] sm:$0x1f] }
  0x48   :  { %v592_v32 = vpop.eup %591  ;;  %498 = vst [vmem:[#allocation5 + $0xc8] sm:$0x1f] %v301_v28  ;;  %v333_v33 = vadd.f32 1.0, %v332_v27  ;;  %v338_v34 = vadd.f32 1.0, %v53_v13  ;;  %vm864_vm13 = vcmp.lt.f32.partialorder %v335_v31, 0.0004427343  ;;  %v325_v40 = vmul.f32 %v324_v25, %v51_v63 }
  0x49   :  { %v310_v36 = vsel %vm846_vm10, %v307_v15, %v304_v29  ;;  %v313_v37 = vmul.f32 0.6931472, %v592_v32  ;;  %v341_v39 = vmul.f32 -0.5, %v53_v13  ;;  %v344_v41 = vand.u32 2147483647, %v53_v13 }
  0x4a   :  { %499 = vst [vmem:[#allocation5 + $0xd0] sm:$0x1f] %v310_v36  ;;  %597 = vlog2.f32 %v338_v34  ;;  %v347_v42 = vadd.f32 1.0, %v54_v22  ;;  %v594_v43 = vpop.eup %593  ;;  %v350_v46 = vmul.f32 -0.5, %v54_v22  ;;  %v353_v47 = vand.u32 2147483647, %v54_v22 }
  0x4b   :  { %v319_v44 = vsel %vm850_vm11, %v316_v24, %v313_v37  ;;  %v342_v45 = vadd.f32 1.0, %v341_v39  ;;  %v56_v48 = vld [vmem:[#allocation2 + $0x108] sm:$0x1f]  ;;  %v322_v49 = vmul.f32 0.6931472, %v594_v43  ;;  %v334_v50 = vmul.f32 %v333_v33, %v52_v4 }
  0x4c   :  { %500 = vst [vmem:[#allocation5 + $0xd8] sm:$0x1f] %v319_v44  ;;  %vm870_vm14 = vcmp.lt.f32.partialorder %v344_v41, 0.0004427343  ;;  %599 = vlog2.f32 %v347_v42  ;;  %v351_v53 = vadd.f32 1.0, %v350_v46  ;;  %v356_v55 = vadd.f32 1.0, %v55_v35 }
  0x4d   :  { %v343_v52 = vmul.f32 %v342_v45, %v53_v13  ;;  %vm874_vm15 = vcmp.lt.f32.partialorder %v353_v47, 0.0004427343  ;;  %v57_v56 = vld [vmem:[#allocation2 + $0x110] sm:$0x1f]  ;;  %v596_v57 = vpop.eup %595  ;;  %v328_v58 = vsel %vm858_vm12, %v325_v40, %v322_v49  ;;  %v359_v59 = vmul.f32 -0.5, %v55_v35 }
  0x4e   :  { %v362_v60 = vand.u32 2147483647, %v55_v35  ;;  %v365_v61 = vadd.f32 1.0, %v56_v48  ;;  %v58_v62 = vld [vmem:[#allocation2 + $0x118] sm:$0x1f]  ;;  %v352_v0 = vmul.f32 %v351_v53, %v54_v22  ;;  %601 = vlog2.f32 %v356_v55 }
  0x4f   :  { %501 = vst [vmem:[#allocation5 + $0xe0] sm:$0x1f] %v328_v58  ;;  %v331_v63 = vmul.f32 0.6931472, %v596_v57  ;;  %v368_v1 = vmul.f32 -0.5, %v56_v48  ;;  %v360_v3 = vadd.f32 1.0, %v359_v59 }
  0x50   :  { %v598_v2 = vpop.eup %597  ;;  %vm880_vm0 = vcmp.lt.f32.partialorder %v362_v60, 0.0004427343  ;;  %603 = vlog2.f32 %v365_v61  ;;  %v371_v5 = vand.u32 2147483647, %v56_v48  ;;  %v374_v9 = vadd.f32 1.0, %v57_v56 }
  0x51   :  { %v337_v6 = vsel %vm864_vm13, %v334_v50, %v331_v63  ;;  %v340_v7 = vmul.f32 0.6931472, %v598_v2  ;;  %v369_v8 = vadd.f32 1.0, %v368_v1  ;;  %v59_v10 = vld [vmem:[#allocation2 + $0x120] sm:$0x1f]  ;;  %v361_v12 = vmul.f32 %v360_v3, %v55_v35 }
  0x52   :  { %v600_v11 = vpop.eup %599  ;;  %502 = vst [vmem:[#allocation5 + $0xe8] sm:$0x1f] %v337_v6  ;;  %vm886_vm1 = vcmp.lt.f32.partialorder %v371_v5, 0.0004427343  ;;  %v377_v14 = vmul.f32 -0.5, %v57_v56  ;;  %v383_v15 = vadd.f32 1.0, %v58_v62  ;;  %605 = vlog2.f32 %v374_v9 }
  0x53   :  { %v346_v16 = vsel %vm870_vm14, %v343_v52, %v340_v7  ;;  %v349_v17 = vmul.f32 0.6931472, %v600_v11  ;;  %v370_v18 = vmul.f32 %v369_v8, %v56_v48  ;;  %v380_v20 = vand.u32 2147483647, %v57_v56  ;;  %v60_v27 = vld [vmem:[#allocation2 + $0x128] sm:$0x1f] }
  0x54   :  { %503 = vst [vmem:[#allocation5 + $0xf0] sm:$0x1f] %v346_v16  ;;  %v378_v19 = vadd.f32 1.0, %v377_v14  ;;  %607 = vlog2.f32 %v383_v15  ;;  %v386_v21 = vmul.f32 -0.5, %v58_v62  ;;  %v602_v22 = vpop.eup %601  ;;  %v389_v24 = vand.u32 2147483647, %v58_v62 }
  0x55   :  { %v355_v23 = vsel %vm874_vm15, %v352_v0, %v349_v17  ;;  %v392_v25 = vadd.f32 1.0, %v59_v10  ;;  %v395_v26 = vmul.f32 -0.5, %v59_v10  ;;  %v358_v29 = vmul.f32 0.6931472, %v602_v22  ;;  %v61_v31 = vld [vmem:[#allocation2 + $0x130] sm:$0x1f] }
  0x56   :  { %v604_v28 = vpop.eup %603  ;;  %504 = vst [vmem:[#allocation5 + $0xf8] sm:$0x1f] %v355_v23  ;;  %v379_v30 = vmul.f32 %v378_v19, %v57_v56  ;;  %vm894_vm2 = vcmp.lt.f32.partialorder %v380_v20, 0.0004427343  ;;  %v387_v34 = vadd.f32 1.0, %v386_v21  ;;  %v401_v38 = vadd.f32 1.0, %v60_v27 }
  0x57   :  { %v367_v32 = vmul.f32 0.6931472, %v604_v28  ;;  %609 = vlog2.f32 %v392_v25  ;;  %v364_v35 = vsel %vm880_vm0, %v361_v12, %v358_v29  ;;  %v396_v36 = vadd.f32 1.0, %v395_v26  ;;  %v62_v39 = vld [vmem:[#allocation2 + $0x138] sm:$0x1f] }
  0x58   :  { %v398_v37 = vand.u32 2147483647, %v59_v10  ;;  %v606_v40 = vpop.eup %605  ;;  %505 = vst [vmem:[#allocation5 + $0x100] sm:$0x1f] %v364_v35  ;;  %v388_v42 = vmul.f32 %v387_v34, %v58_v62  ;;  %vm902_vm3 = vcmp.lt.f32.partialorder %v389_v24, 0.0004427343  ;;  %611 = vlog2.f32 %v401_v38 }
  0x59   :  { %v373_v41 = vsel %vm886_vm1, %v370_v18, %v367_v32  ;;  %v404_v44 = vmul.f32 -0.5, %v60_v27  ;;  %v376_v46 = vmul.f32 0.6931472, %v606_v40  ;;  %v407_v47 = vand.u32 2147483647, %v60_v27 }
  0x5a   :  { %v608_v45 = vpop.eup %607  ;;  %506 = vst [vmem:[#allocation5 + $0x108] sm:$0x1f] %v373_v41  ;;  %v397_v49 = vmul.f32 %v396_v36, %v59_v10  ;;  %v410_v51 = vadd.f32 1.0, %v61_v31  ;;  %v63_v52 = vld [vmem:[#allocation2 + $0x140] sm:$0x1f]  ;;  %v413_v55 = vmul.f32 -0.5, %v61_v31 }
  0x5b   :  { %v385_v48 = vmul.f32 0.6931472, %v608_v45  ;;  %v405_v50 = vadd.f32 1.0, %v404_v44  ;;  %v382_v53 = vsel %vm894_vm2, %v379_v30, %v376_v46  ;;  %vm908_vm4 = vcmp.lt.f32.partialorder %v398_v37, 0.0004427343 }
  0x5c   :  { %v419_v56 = vadd.f32 1.0, %v62_v39  ;;  %507 = vst [vmem:[#allocation5 + $0x110] sm:$0x1f] %v382_v53  ;;  %613 = vlog2.f32 %v410_v51  ;;  %v416_v59 = vand.u32 2147483647, %v61_v31  ;;  %v422_v60 = vmul.f32 -0.5, %v62_v39 }
  0x5d   :  { %v610_v57 = vpop.eup %609  ;;  %v391_v58 = vsel %vm902_vm3, %v388_v42, %v385_v48  ;;  %v414_v62 = vadd.f32 1.0, %v413_v55  ;;  %v428_v63 = vadd.f32 1.0, %v63_v52  ;;  %v406_v0 = vmul.f32 %v405_v50, %v60_v27  ;;  %v64_v4 = vld [vmem:[#allocation2 + $0x148] sm:$0x1f]  ;;  %v65_v9 = vld [vmem:[#allocation2 + $0x150] sm:$0x1f] }
  0x5e   :  { %508 = vst [vmem:[#allocation5 + $0x118] sm:$0x1f] %v391_v58  ;;  %v394_v61 = vmul.f32 0.6931472, %v610_v57  ;;  %615 = vlog2.f32 %v419_v56  ;;  %v423_v1 = vadd.f32 1.0, %v422_v60  ;;  %v431_v3 = vmul.f32 -0.5, %v63_v52  ;;  %v612_v5 = vpop.eup %611 }
  0x5f   :  { %v425_v2 = vand.u32 2147483647, %v62_v39  ;;  %vm916_vm5 = vcmp.lt.f32.partialorder %v407_v47, 0.0004427343  ;;  %617 = vlog2.f32 %v428_v63  ;;  %v434_v8 = vand.u32 2147483647, %v63_v52 }
  0x60   :  { %v400_v6 = vsel %vm908_vm4, %v397_v49, %v394_v61  ;;  %v403_v10 = vmul.f32 0.6931472, %v612_v5  ;;  %v415_v11 = vmul.f32 %v414_v62, %v61_v31  ;;  %vm920_vm6 = vcmp.lt.f32.partialorder %v416_v59, 0.0004427343  ;;  %v66_v23 = vld [vmem:[#allocation2 + $0x158] sm:$0x1f] }
  0x61   :  { %509 = vst [vmem:[#allocation5 + $0x120] sm:$0x1f] %v400_v6  ;;  %v424_v13 = vmul.f32 %v423_v1, %v62_v39  ;;  %vm924_vm7 = vcmp.lt.f32.partialorder %v425_v2, 0.0004427343  ;;  %v432_v15 = vadd.f32 1.0, %v431_v3  ;;  %v437_v16 = vadd.f32 1.0, %v64_v4 }
  0x62   :  { %v440_v17 = vmul.f32 -0.5, %v64_v4  ;;  %v614_v18 = vpop.eup %613  ;;  %v409_v19 = vsel %vm916_vm5, %v406_v0, %v403_v10  ;;  %vm930_vm8 = vcmp.lt.f32.partialorder %v434_v8, 0.0004427343  ;;  %v446_v21 = vadd.f32 1.0, %v65_v9  ;;  %v67_v35 = vld [vmem:[#allocation2 + $0x160] sm:$0x1f] }
  0x63   :  { %v449_v22 = vmul.f32 -0.5, %v65_v9  ;;  %510 = vst [vmem:[#allocation5 + $0x128] sm:$0x1f] %v409_v19  ;;  %v412_v25 = vmul.f32 0.6931472, %v614_v18  ;;  %619 = vlog2.f32 %v437_v16  ;;  %v433_v28 = vmul.f32 %v432_v15, %v63_v52 }
  0x64   :  { %v616_v24 = vpop.eup %615  ;;  %v441_v26 = vadd.f32 1.0, %v440_v17  ;;  %v443_v29 = vand.u32 2147483647, %v64_v4  ;;  %621 = vlog2.f32 %v446_v21  ;;  %v452_v33 = vand.u32 2147483647, %v65_v9 }
  0x65   :  { %v421_v27 = vmul.f32 0.6931472, %v616_v24  ;;  %v618_v30 = vpop.eup %617  ;;  %v418_v31 = vsel %vm920_vm6, %v415_v11, %v412_v25  ;;  %v450_v32 = vadd.f32 1.0, %v449_v22  ;;  %v455_v34 = vadd.f32 1.0, %v66_v23 }
  0x66   :  { %511 = vst [vmem:[#allocation5 + $0x130] sm:$0x1f] %v418_v31  ;;  %v430_v37 = vmul.f32 0.6931472, %v618_v30  ;;  %v458_v38 = vmul.f32 -0.5, %v66_v23  ;;  %v442_v39 = vmul.f32 %v441_v26, %v64_v4  ;;  %v464_v42 = vadd.f32 1.0, %v67_v35 }
  0x67   :  { %v427_v36 = vsel %vm924_vm7, %v424_v13, %v421_v27  ;;  %623 = vlog2.f32 %v455_v34  ;;  %v467_v43 = vmul.f32 -0.5, %v67_v35  ;;  %vm444_vm9 = vcmp.lt.f32.partialorder %v443_v29, 0.0004427343 }
  0x68   :  { %512 = vst [vmem:[#allocation5 + $0x138] sm:$0x1f] %v427_v36  ;;  %v436_v40 = vsel %vm930_vm8, %v433_v28, %v430_v37  ;;  %v459_v41 = vadd.f32 1.0, %v458_v38  ;;  %v451_v45 = vmul.f32 %v450_v32, %v65_v9  ;;  %v461_v46 = vand.u32 2147483647, %v66_v23 }
  0x69   :  { %v620_v44 = vpop.eup %619  ;;  %513 = vst [vmem:[#allocation5 + $0x140] sm:$0x1f] %v436_v40  ;;  %vm453_vm10 = vcmp.lt.f32.partialorder %v452_v33, 0.0004427343  ;;  %625 = vlog2.f32 %v464_v42  ;;  %v468_v50 = vadd.f32 1.0, %v467_v43 }
  0x6a   :  { %v622_v47 = vpop.eup %621  ;;  %v439_v48 = vmul.f32 0.6931472, %v620_v44  ;;  %v460_v52 = vmul.f32 %v459_v41, %v66_v23  ;;  %v470_v53 = vand.u32 2147483647, %v67_v35  ;;  %vm462_vm11 = vcmp.lt.f32.partialorder %v461_v46, 0.0004427343 }
  0x6b   :  { %v448_v49 = vmul.f32 0.6931472, %v622_v47  ;;  %v469_v57 = vmul.f32 %v468_v50, %v67_v35 }
  0x6c   :  { %v445_v51 = vsel %vm444_vm9, %v442_v39, %v439_v48  ;;  %vm471_vm12 = vcmp.lt.f32.partialorder %v470_v53, 0.0004427343 }
  0x6d   :  { %v624_v54 = vpop.eup %623  ;;  %514 = vst [vmem:[#allocation5 + $0x148] sm:$0x1f] %v445_v51  ;;  %v454_v55 = vsel %vm453_vm10, %v451_v45, %v448_v49 }
  0x6e   :  { %515 = vst [vmem:[#allocation5 + $0x150] sm:$0x1f] %v454_v55  ;;  %v457_v56 = vmul.f32 0.6931472, %v624_v54 }
  0x6f   :  { %v626_v58 = vpop.eup %625 }
  0x70   :  { %v463_v59 = vsel %vm462_vm11, %v460_v52, %v457_v56  ;;  %v466_v60 = vmul.f32 0.6931472, %v626_v58 }
  0x71   :  { %516 = vst [vmem:[#allocation5 + $0x158] sm:$0x1f] %v463_v59 }
  0x72   :  { %v472_v61 = vsel %vm471_vm12, %v469_v57, %v466_v60 }
  0x73   :  { %517 = vst [vmem:[#allocation5 + $0x160] sm:$0x1f] %v472_v61 }
  0x74   :  { %528 = dma.vmem_to_hbm [thread:$0]  %s524_s11, 5760, %s526_s14, [#allocation4]  }
  0x75   :  { %677 = dma.done.wait [#allocation4], 5760  }
  0x76   :  { %678 = vsyncadd [#allocation4], 4294961536 }
  0x77   :  { %533 = vsyncpa [#allocation3], 1 }
  0x78   :  { %534 = vsyncpa [#allocation4], 1 }

</bundles_post_ra>
